<compile_context>
chip_gen: v6e
topology: v6e:2x2x1
jax: 0.10.0
libtpu: 0.0.40
codegen_flags: <defaults>
</compile_context>

<pallas_src>
import math

import jax
import jax.numpy as jnp
from jax.experimental import pallas as pl
from jax.experimental.pallas import tpu as pltpu


def make_positional_encoding(d_embed: int, max_len: int = 4096,
                             dtype=jnp.float32) -> jnp.ndarray:
    """Deterministic PE buffer (matches the PyTorch __init__, fixed for odd
    d_embed). Built once, in the activation dtype, so the forward pass does
    no per-call slice/cast over the table."""
    position = jnp.arange(0, max_len, dtype=jnp.float32)[:, None]            # (max_len, 1)
    div_term = jnp.exp(
        jnp.arange(0, d_embed, 2, dtype=jnp.float32) * -(math.log(10000.0) / d_embed)
    )                                                                         # (ceil(D/2),)
    ang = position * div_term                                                 # (max_len, ceil(D/2))
    enc = jnp.zeros((max_len, d_embed), dtype=jnp.float32)
    enc = enc.at[:, 0::2].set(jnp.sin(ang))
    enc = enc.at[:, 1::2].set(jnp.cos(ang)[:, : d_embed // 2])
    return enc.astype(dtype)                                                  # (max_len, d_embed)


def _add_pe_kernel(x_ref, pe_ref, o_ref):
    # Pure elementwise VPU add on (TR, D) tiles; the PE tile's block index is
    # independent of the inner batch axis, so it stays resident (no re-DMA).
    o_ref[...] = x_ref[...] + pe_ref[...]


def _choose_row_tile(n_rows: int, n_cols: int, itemsize: int, batch: int,
                     per_buffer_bytes: int = 4 * 1024 * 1024,
                     min_grid_steps: int = 8) -> int:
    """Pick a row (sequence) tile:
      * aligned to the dtype's sublane packing (8 f32 / 16 bf16 / 32 int8),
      * each tile buffer <= per_buffer_bytes (so ~6 live buffers fit the
        explicit 32 MiB vmem_limit on every TPU generation),
      * shrunk if necessary so the grid keeps >= min_grid_steps steps
        (megacore sharding + double-buffer overlap).
    Used with a cdiv grid, so it never needs to divide n_rows exactly."""
    sublane = max(32 // max(itemsize, 1), 8)        # 8 f32, 16 bf16, 32 int8/fp8
    if n_rows <= sublane:
        return n_rows                               # full extent: always legal

    max_rows = max(per_buffer_bytes // max(n_cols * itemsize, 1), sublane)
    tr = max((max_rows // sublane) * sublane, sublane)

    # No point exceeding the (sublane-rounded) row extent.
    rounded_rows = ((n_rows + sublane - 1) // sublane) * sublane
    tr = min(tr, rounded_rows)

    # Keep enough grid steps for megacore utilization and pipelining.
    while tr > sublane and pl.cdiv(n_rows, tr) * batch < min_grid_steps:
        new_tr = max(((tr // 2) // sublane) * sublane, sublane)
        if new_tr == tr:
            break
        tr = new_tr
    return tr


def positional_encoding_forward(x: jnp.ndarray, pe_table: jnp.ndarray,
                                *, donate_x: bool = False) -> jnp.ndarray:
    """x: (B, S, D); pe_table: (max_len, D), ideally already in x.dtype.
    Returns x + PE[:S] in x.dtype."""
    B, S, D = x.shape
    max_len, d_pe = pe_table.shape
    assert d_pe == D, "PE table embedding dim mismatch"
    assert max_len >= S, "sequence longer than PE table"

    if pe_table.dtype != x.dtype:
        # Fallback cast; prefer building the table in the activation dtype at init.
        pe_table = pe_table.astype(x.dtype)

    itemsize = jnp.dtype(x.dtype).itemsize
    TR = _choose_row_tile(S, D, itemsize, B)
    grid = (pl.cdiv(S, TR), B)               # batch innermost => PE tile reused across B

    # TODO(synk): if D is far from a multiple of 128 and profiling shows the
    # masked lane stores dominating, pad D to the next multiple of 128 upstream
    # (a lane-dense reshape here risks an XLA relayout copy costing more than
    # it saves for this HBM-bound add).

    extra_kwargs = {}
    if donate_x:
        # Caller guarantees x is donated: reuse its HBM buffer for the output.
        extra_kwargs["input_output_aliases"] = {0: 0}

    out = pl.pallas_call(
        _add_pe_kernel,
        out_shape=jax.ShapeDtypeStruct((B, S, D), x.dtype),
        grid_spec=pltpu.PrefetchScalarGridSpec(
            num_scalar_prefetch=0,
            grid=grid,
            in_specs=[
                # x: one (TR, D) tile of one batch element; leading dim squeezed.
                pl.BlockSpec((pl.Squeezed(), TR, D), lambda r, b: (b, r, 0)),
                # PE: shared (TR, D) tile read straight out of the full table;
                # index independent of b -> DMA skipped on inner batch steps.
                pl.BlockSpec((TR, D), lambda r, b: (r, 0)),
            ],
            out_specs=pl.BlockSpec((pl.Squeezed(), TR, D), lambda r, b: (b, r, 0)),
        ),
        compiler_params=pltpu.CompilerParams(
            # Both axes independent: megacore (v7x) can shard either one.
            dimension_semantics=("parallel", "parallel"),
            # Explicit scoped-VMEM budget: 6 live ~4 MiB buffers <= 24 MiB,
            # valid on v5e/v6e (128 MiB) and v7x (64 MiB physical VMEM).
            vmem_limit_bytes=32 * 1024 * 1024,
        ),
        **extra_kwargs,
    )(x, pe_table)

    return out


if __name__ == "__main__":
    # Small shapes consistent with the module's forward: (batch, seq_len, d_embed)
    B, S, D = 2, 8, 32
    MAX_LEN = 64

    key = jax.random.PRNGKey(0)
    x = jax.random.normal(key, (B, S, D), dtype=jnp.float32)

    pe_table = make_positional_encoding(D, max_len=MAX_LEN, dtype=x.dtype)

    out = positional_encoding_forward(x, pe_table)
    out = jax.block_until_ready(out)

    # Reference check (pure JAX).
    ref = x + pe_table[None, :S, :].astype(x.dtype)
    assert out.shape == (B, S, D)
    assert jnp.allclose(out, ref, atol=1e-6), "mismatch vs reference"

    print("KERNEL_OK")
</pallas_src>

<mosaic_0001>
module attributes {stable_mosaic.version = 11 : i64} {
  func.func @_add_pe_kernel(%arg0: i32, %arg1: i32, %arg2: memref<1x8x32xf32, #tpu.memory_space<vmem>>, %arg3: memref<8x32xf32, #tpu.memory_space<vmem>>, %arg4: memref<1x8x32xf32, #tpu.memory_space<vmem>>) attributes {dimension_semantics = [#tpu.dimension_semantics<parallel>, #tpu.dimension_semantics<parallel>], iteration_bounds = array<i64: 1, 2>, scalar_prefetch = 0 : i64, scratch_operands = 0 : i64, tpu.core_type = #tpu.core_type<tc>, window_params = [{transform_indices = @transform_0, window_bounds = array<i64: 1, 8, 32>}, {transform_indices = @transform_1, window_bounds = array<i64: 8, 32>}, {transform_indices = @transform_2, window_bounds = array<i64: 1, 8, 32>}]} {
    %c0 = arith.constant 0 : index
    %c0_0 = arith.constant 0 : index
    %c0_1 = arith.constant 0 : index
    %0 = vector.load %arg2[%c0, %c0_0, %c0_1] : memref<1x8x32xf32, #tpu.memory_space<vmem>>, vector<1x8x32xf32>
    %1 = vector.shape_cast %0 : vector<1x8x32xf32> to vector<8x32xf32>
    %c0_2 = arith.constant 0 : index
    %c0_3 = arith.constant 0 : index
    %2 = vector.load %arg3[%c0_2, %c0_3] : memref<8x32xf32, #tpu.memory_space<vmem>>, vector<8x32xf32>
    %3 = arith.addf %1, %2 : vector<8x32xf32>
    %c0_4 = arith.constant 0 : index
    %c0_5 = arith.constant 0 : index
    %c0_6 = arith.constant 0 : index
    %4 = vector.load %arg4[%c0_4, %c0_5, %c0_6] : memref<1x8x32xf32, #tpu.memory_space<vmem>>, vector<1x8x32xf32>
    %5 = vector.shape_cast %4 : vector<1x8x32xf32> to vector<8x32xf32>
    %6 = vector.shape_cast %3 : vector<8x32xf32> to vector<1x8x32xf32>
    tpu.vector_store %arg4[%c0_4, %c0_5, %c0_6], %6 {strides = array<i32>} : memref<1x8x32xf32, #tpu.memory_space<vmem>>, vector<1x8x32xf32>,
    return
  }
  func.func @transform_0(%arg0: i32, %arg1: i32) -> (i32, i32, i32) {
    %c0_i32 = arith.constant 0 : i32
    %c0_i32_0 = arith.constant 0 : i32
    return %arg1, %arg0, %c0_i32 : i32, i32, i32
  }
  func.func @transform_1(%arg0: i32, %arg1: i32) -> (i32, i32) {
    %c0_i32 = arith.constant 0 : i32
    %c0_i32_0 = arith.constant 0 : i32
    return %arg0, %c0_i32 : i32, i32
  }
  func.func @transform_2(%arg0: i32, %arg1: i32) -> (i32, i32, i32) {
    %c0_i32 = arith.constant 0 : i32
    %c0_i32_0 = arith.constant 0 : i32
    return %arg1, %arg0, %c0_i32 : i32, i32, i32
  }
}

</mosaic_0001>

<bundles_post_ra>
// kernel: tpu_custom_call.1
= control target key start
LH: loop header
LB: loop body
LE: loop exit
PB: predicated region body
PF: predicated region fallthrough
CT: control target
= control target key end

     0   :  { %7 = vsyncpa [#allocation3], 0  ;;  %s550_s0 = inlined_call_operand.vmem [shape: f32[2,8,32], index: 0, kind: input, shape index: {}]   ;;  %s551_s1 = inlined_call_operand.vmem [shape: f32[64,32], index: 1, kind: input, shape index: {}]   ;;  %s552_s2 = inlined_call_operand.hbm [shape: f32[2,8,32], index: 2, kind: output, shape index: {}]  }
   0x1   :  { %9 = vsyncpa [#allocation3 + $0x1], 0  ;;  %s448_s9 = smov 0   ;;  %s450_s10 = smov 0  }
   0x2   :  { %s452_s11 = smov 0   ;;  %s454_s12 = smov 0  }
   0x3   :  { %s456_s13 = smov 0   ;;  %s458_s14 = smov 0  }
   0x4 LB: > { %s287_s15 = sadd.s32 4294967295, %s430_s14   ;;  %s288_s16 = sadd.s32 4294967294, %s430_s14   ;;  %s430_s14 = sphi %s458_s14, %s15_s14   ;;  %s426_s13 = sphi %s456_s13, %s559_s13   ;;  %s422_s12 = sphi %s454_s12, %s558_s12   ;;  %s418_s11 = sphi %s452_s11, %s557_s11   ;;  %s414_s10 = sphi %s450_s10, %s556_s10   ;;  %s410_s9 = sphi %s448_s9, %s555_s9  }
   0x5   : > { %s24_s17 = sadd.s32 1, %s426_s13  ;;  %s90_s18 = sadd.s32 1, %s418_s11 }
   0x6   : > { %p25_p0 = scmp.ge.s32.totalorder %s24_s17, 2  ;;  %p100_p1 = scmp.ne.s32.totalorder %s418_s11, %s414_s10 }
   0x7   : > { %p101_p2 = scmp.eq.s32.totalorder %s287_s15, 1  ;;  %p106_p3 = scmp.ne.s32.totalorder %s414_s10, %s410_s9 }
   0x8   : > { %s561_s17 = smov (%p25_p0, %s24_s17), 0  ;;  %p107_p5 = scmp.eq.s32.totalorder %s288_s16, 1 }
   0x9   : > { %p488_p4 = por %p101_p2, %p100_p1  ;;  %s85_s20 = ssub.s32 %s426_s13, %s561_s17 }
   0xa   : > { %p292_p6 = scmp.ge.s32.totalorder %s430_s14, 1  ;;  %p88_p7 = scmp.eq.s32.totalorder %s85_s20, 0 }
   0xb   : > { %p495_p8 = por %p107_p5, %p106_p3  ;;  %p142_p9 = scmp.lt.s32.totalorder %s430_s14, 3 }
   0xc   : > { %s501_s22 = scalar_select %p88_p7, %s418_s11, %s90_s18  }
   0xd   : > { %p143_p10 = pnand %p292_p6, %p142_p9 }
   0xe   : > { %s167_s23 = sand.u32 (!%p143_p10), 1, %s414_s10   ;;  %p170_p11 = scmp.lt.s32.totalorder (!%p143_p10), %s422_s12, 1 }
   0xf   : > { %146 = sbr.rel (%p143_p10) target bundleno = 42 (0x2a), region = 28  ;;  %s293_s24 = sshll.u32 (!%p143_p10), %s167_s23, 3 }
  0x10   : > { %s296_s26 = sshll.u32 (!%p143_p10), %s422_s12, 7  ;;  %s169_s30 = scalar_lea.vmem (!%p143_p10), [#allocation2], %s293_s24 }
  0x11   : > { %s201_s3 = sshll.u32 (!%p143_p10), %s169_s30, 4  ;;  %s199_s15 = scalar_lea.hbm (!%p143_p10), %s552_s2, %s296_s26  ;;  %s202_s3 = int_to_ptr.vmem [resolvable:$true] %s201_s3 }
  0x12   : > { %s354_s16 = scalar_lea.vmem (!%p143_p10), %s202_s3, 128  ;;  %s432_s18 = smov (!%p143_p10), [#allocation2]  }
  0x13   : > { %p355_p12 = scmp.ne.s32.totalorder (!%p143_p10), %s202_s3, %s354_s16  ;;  %s358_s20 = sshll.u32 (!%p143_p10), %s432_s18, 4  ;;  %s359_s20 = int_to_ptr.vmem [resolvable:$false] %s358_s20 }
  0x14   : > { %s171_s25 = scalar_select %p170_p11, %s422_s12, 1  ;;  %v182_v0 = vld [vmem:[%s551_s1] sm:$0xff]  ;;  %vm184_vm0 = vcmask 261120  }
  0x15   : > { %s187_s12 = scalar_lea.sflag [#allocation3], %s167_s23  ;;  %p356_p13 = pnand %p355_p12, %p488_p4 }
  0x16   : > { %s294_s27 = sshll.u32 %s171_s25, 3  ;;  %s360_s24 = scalar_lea.vmem %s359_s20, 256 }
  0x17   : > { %s176_s6 = scalar_lea.vmem %s550_s0, %s294_s27  ;;  %p357_p0 = pneg %p356_p13 }
  0x18   : > { %v181_v1 = vld [vmem:[%s176_s6] sm:$0xff]  ;;  %p361_p1 = scmp.lt.s32.totalorder %s202_s3, %s359_s20  ;;  %p362_p2 = scmp.lt.s32.totalorder %s360_s24, %s354_s16 }
  0x19   : > { %v183_v2 = vadd.f32 %v182_v0, %v181_v1 }
  0x1a   : > { %p363_p3 = por %p362_p2, %p361_p1 }
  0x1b   : > { %185 = vst.msk [vmem:[%s169_s30] sm:$0xff] %vm184_vm0, %v183_v2 }
  0x1c   : > { %p364_p5 = pnand %p363_p3, %p357_p0 }
  0x1e   : > { %367 = shalt.err (!%p364_p5)
}
  0x1f   : > { %s368_s25 = scalar_lea.hbm %s199_s15, 128  ;;  %s372_s27 = scalar_lea.hbm %s552_s2, 256 }
  0x20   : > { %p369_p6 = scmp.ne.s32.totalorder %s199_s15, %s368_s25  ;;  %p373_p10 = scmp.lt.s32.totalorder %s199_s15, %s552_s2 }
  0x21   : > { %p374_p11 = scmp.lt.s32.totalorder %s372_s27, %s368_s25 }
  0x22   : > { %p370_p7 = pnand %p369_p6, %p488_p4 }
  0x23   : > { %p375_p12 = por %p374_p11, %p373_p10 }
  0x24   : > { %p371_p9 = pneg %p370_p7 }
  0x26   : > { %p376_p13 = pnand %p375_p12, %p371_p9 }
  0x28   : > { %379 = shalt.err (!%p376_p13)
}
  0x29   : > { %299 = dma.vmem_to_hbm [thread:$0]  (%p488_p4), %s202_s3, 128, %s199_s15, %s187_s12  }
  0x2a PF: > { %p305_p0 = scmp.ge.s32.totalorder %s430_s14, 2  ;;  %s213_s30 = sand.u32 1, %s410_s9  }
  0x2b   : > { %s214_s4 = scalar_lea.sflag [#allocation3], %s213_s30 }
  0x2c   : > { %p302_p1 = pnand %p305_p0, %p495_p8 }
  0x2e   : > { %p303_p2 = pneg %p302_p1 }
  0x30   : > { %405 = dma.done.wait (%p303_p2), %s214_s4, 128  }
  0x31   : > { %407 = vsyncadd (%p303_p2), %s214_s4, 4294967168  ;;  %s15_s14 = sadd.s32 1, %s430_s14   ;;  %s555_s9 = smov %s414_s10 }
  0x32   : > { %p12_p3 = scmp.ge.s32.totalorder %s15_s14, 4   ;;  %s556_s10 = smov %s418_s11 }
  0x33   : > { %s557_s11 = smov %s501_s22  ;;  %s558_s12 = smov %s426_s13 }
  0x34   : > { %s559_s13 = smov %s561_s17  ;;  %14 = sbr.rel (!%p12_p3) target bundleno = 4 (0x4), region = 66 }
  0x39   :  { %219 = vsyncpa [#allocation3], 1 }
  0x3a   :  { %221 = vsyncpa [#allocation3 + $0x1], 1 }

</bundles_post_ra>
